<compile_context>
chip_gen: v7x
topology: tpu7x:2x2x1
jax: 0.10.0
libtpu: 0.0.40
codegen_flags: <defaults>
</compile_context>

<pallas_src>
import functools

import jax
import jax.numpy as jnp
from jax import lax
from jax.experimental import pallas as pl
from jax.experimental.pallas import tpu as pltpu

LANES = 512                        # lane-dense last dim (multiple of 128)
SMALL_INPUT_THRESHOLD = 1 << 20    # below this, plain jnp beats kernel overhead


def _bce_elementwise(x, y):
    # Numerically-stable BCE with logits (same formulation PyTorch uses):
    #   loss = max(x, 0) - x * y + log(1 + exp(-|x|))
    x = x.astype(jnp.float32)
    y = y.astype(jnp.float32)
    return jnp.maximum(x, 0.0) - x * y + jnp.log1p(jnp.exp(-jnp.abs(x)))


def _bce_sum_kernel(valid_rows, x_ref, y_ref, o_ref):
    """Accumulate the BCE-loss sum of one (block_rows, lanes) tile into o_ref.

    `valid_rows` is the static number of real rows in the 2-D input; rows of a
    partial / overshoot block beyond it are masked so they contribute zero.
    """
    # o_ref is an (8, lanes) f32 partial-sum block, resident across the inner
    # (reduction) grid axis because its block index only depends on axis 0.
    @pl.when(pl.program_id(1) == 0)
    def _():
        o_ref[...] = jnp.zeros_like(o_ref)

    block_rows = x_ref.shape[0]
    r0 = (pl.program_id(0) * pl.num_programs(1) + pl.program_id(1)) * block_rows

    loss = _bce_elementwise(x_ref[...], y_ref[...])

    # Mask rows past the end of the (unpadded) input.  The VPU compare+select
    # is free relative to the HBM-bound stream; garbage in the out-of-bounds
    # part of a partial block never reaches the accumulator.
    row_ids = lax.broadcasted_iota(jnp.int32, loss.shape, 0)
    loss = jnp.where(row_ids < (valid_rows - r0), loss, 0.0)

    # Fold (block_rows, lanes) into (8, lanes) with pure VPU vreg adds; the
    # single expensive cross-lane reduce happens once, in the wrapper.
    o_ref[...] += loss.reshape(-1, 8, loss.shape[-1]).sum(axis=0)


def _chip_config():
    kind = jax.devices()[0].device_kind.lower()
    if "v7" in kind:
        # 2 TensorCores per chip: genuinely shard the row range across them.
        return dict(nsplit=2, max_block_rows=1024, vmem_limit=None,
                    axis0=pltpu.CORE_PARALLEL)
    if "v6" in kind:
        # Single TC, 128 MiB VMEM: bigger tiles amortize per-step overhead.
        return dict(nsplit=1, max_block_rows=2048, vmem_limit=48 * 1024 * 1024,
                    axis0=pltpu.ARBITRARY)
    # v5e / anything else: stay inside the 16 MiB scoped-VMEM default.
    return dict(nsplit=1, max_block_rows=1024, vmem_limit=None,
                axis0=pltpu.ARBITRARY)


def binary_cross_entropy_with_logits(output, label, *, lanes=LANES,
                                     force_kernel=False):
    """Mean BCE-with-logits over all elements (PyTorch default reduction)."""
    assert output.shape == label.shape
    n = output.size
    x_flat = output.reshape(-1)
    y_flat = label.reshape(-1)

    # For inputs with very few 512-wide rows, narrow the lane width so the
    # kernel still sees a healthy number of sublane rows.
    while lanes > 128 and (n // lanes) < 8:
        lanes //= 2

    rows = n // lanes                 # full lane-dense rows
    tail = n - rows * lanes           # leftover elements (< lanes)

    # Small-input fast path: pallas_call / DMA fixed overhead would dominate.
    if rows == 0 or (not force_kernel and n < SMALL_INPUT_THRESHOLD):
        total = jnp.sum(_bce_elementwise(x_flat, y_flat), dtype=jnp.float32)
        return (total / jnp.float32(n)).astype(output.dtype)

    cfg = _chip_config()
    nsplit = cfg["nsplit"]
    axis0_sem = cfg["axis0"]
    if rows < nsplit * 8:             # too small to shard across cores
        nsplit, axis0_sem = 1, pltpu.ARBITRARY

    block_rows = min(cfg["max_block_rows"],
                     pl.cdiv(pl.cdiv(rows, nsplit), 8) * 8)
    blocks_per_split = pl.cdiv(rows, nsplit * block_rows)
    last_block = pl.cdiv(rows, block_rows) - 1   # last real block in the array

    # Keep inputs in their native dtype.  When n is a multiple of `lanes`
    # (the common case) the 2-D view is a free reshape: no jnp.pad, no extra
    # HBM copy.  Only a misaligned tail (< lanes elements) is handled in jnp.
    if tail:
        main = rows * lanes
        x_main = lax.slice(x_flat, (0,), (main,)).reshape(rows, lanes)
        y_main = lax.slice(y_flat, (0,), (main,)).reshape(rows, lanes)
        tail_sum = jnp.sum(
            _bce_elementwise(lax.slice(x_flat, (main,), (n,)),
                             lax.slice(y_flat, (main,), (n,))),
            dtype=jnp.float32)
    else:
        x_main = x_flat.reshape(rows, lanes)
        y_main = y_flat.reshape(rows, lanes)
        tail_sum = jnp.float32(0.0)

    def in_map(c, i):
        # Clamp so every grid step addresses a real block; overshoot blocks
        # (possible when nsplit > 1) are fully masked in-kernel and add zero.
        return (jnp.minimum(c * blocks_per_split + i, last_block), 0)

    partials = pl.pallas_call(
        functools.partial(_bce_sum_kernel, rows),
        out_shape=jax.ShapeDtypeStruct((nsplit * 8, lanes), jnp.float32),
        grid_spec=pltpu.PrefetchScalarGridSpec(
            num_scalar_prefetch=0,
            grid=(nsplit, blocks_per_split),
            in_specs=[
                pl.BlockSpec((block_rows, lanes), in_map),
                pl.BlockSpec((block_rows, lanes), in_map),
            ],
            out_specs=pl.BlockSpec((8, lanes), lambda c, i: (c, 0)),
        ),
        compiler_params=pltpu.CompilerParams(
            dimension_semantics=(axis0_sem, pltpu.ARBITRARY),
            vmem_limit_bytes=cfg["vmem_limit"],
        ),
    )(x_main, y_main)

    total = jnp.sum(partials, dtype=jnp.float32) + tail_sum
    mean = total / jnp.float32(n)
    return mean.astype(output.dtype)


if __name__ == "__main__":
    key = jax.random.PRNGKey(0)
    k1, k2, k3, k4, k5, k6 = jax.random.split(key, 6)

    def ref_loss(x, y):
        x = x.astype(jnp.float32)
        y = y.astype(jnp.float32)
        return jnp.mean(jnp.maximum(x, 0.0) - x * y
                        + jnp.log1p(jnp.exp(-jnp.abs(x))))

    # Case 1: the module's NCHW shape (2048 elems), kernel path forced.
    shape1 = (2, 4, 16, 16)
    logits1 = jax.random.normal(k1, shape1, dtype=jnp.float32)
    labels1 = (jax.random.uniform(k2, shape1) > 0.5).astype(jnp.float32)
    loss1 = jax.block_until_ready(
        binary_cross_entropy_with_logits(logits1, labels1, force_kernel=True))
    assert jnp.allclose(loss1, ref_loss(logits1, labels1), rtol=1e-5, atol=1e-6)

    # Case 2: 30 lane-aligned rows -> ragged last row-block masked in-kernel
    # (and the genuine 2-core split on v7x).
    shape2 = (3, 5, 32, 32)
    logits2 = jax.random.normal(k3, shape2, dtype=jnp.float32)
    labels2 = (jax.random.uniform(k4, shape2) > 0.5).astype(jnp.float32)
    loss2 = jax.block_until_ready(
        binary_cross_entropy_with_logits(logits2, labels2, force_kernel=True))
    assert jnp.allclose(loss2, ref_loss(logits2, labels2), rtol=1e-5, atol=1e-6)

    # Case 3: element count not a multiple of the lane width -> sub-row tail
    # summed in plain jnp, rest in the kernel.
    shape3 = (2, 3, 10, 35)   # 2100 elements
    logits3 = jax.random.normal(k5, shape3, dtype=jnp.float32)
    labels3 = (jax.random.uniform(k6, shape3) > 0.5).astype(jnp.float32)
    loss3 = jax.block_until_ready(
        binary_cross_entropy_with_logits(logits3, labels3, force_kernel=True))
    assert jnp.allclose(loss3, ref_loss(logits3, labels3), rtol=1e-5, atol=1e-6)

    # Default path (small-input fast path, no pallas_call) must agree too.
    loss1_fast = jax.block_until_ready(
        binary_cross_entropy_with_logits(logits1, labels1))
    assert jnp.allclose(loss1_fast, ref_loss(logits1, labels1),
                        rtol=1e-5, atol=1e-6)

    print("KERNEL_OK")
</pallas_src>

<mosaic_0001>
module attributes {stable_mosaic.version = 11 : i64} {
  func.func @_bce_sum_kernel(%arg0: i32, %arg1: i32, %arg2: memref<8x256xf32, #tpu.memory_space<vmem>>, %arg3: memref<8x256xf32, #tpu.memory_space<vmem>>, %arg4: memref<8x256xf32, #tpu.memory_space<vmem>>) attributes {dimension_semantics = [#tpu.dimension_semantics<arbitrary>, #tpu.dimension_semantics<arbitrary>], iteration_bounds = array<i64: 1, 1>, scalar_prefetch = 0 : i64, scratch_operands = 0 : i64, tpu.core_type = #tpu.core_type<tc>, window_params = [{transform_indices = @transform_0, window_bounds = array<i64: 8, 256>}, {transform_indices = @transform_1, window_bounds = array<i64: 8, 256>}, {transform_indices = @transform_2, window_bounds = array<i64: 8, 256>}]} {
    %c0_i32 = arith.constant 0 : i32
    %0 = arith.cmpi eq, %arg1, %c0_i32 : i32
    %1 = arith.extui %0 : i1 to i32
    %c0_i32_0 = arith.constant 0 : i32
    %2 = arith.cmpi ne, %1, %c0_i32_0 : i32
    scf.if %2 {
      %cst_12 = arith.constant 0.000000e+00 : f32
      %29 = vector.broadcast %cst_12 : f32 to vector<8x256xf32>
      %c0_13 = arith.constant 0 : index
      %c0_14 = arith.constant 0 : index
      %30 = vector.load %arg4[%c0_13, %c0_14] : memref<8x256xf32, #tpu.memory_space<vmem>>, vector<8x256xf32>
      tpu.vector_store %arg4[%c0_13, %c0_14], %29 {strides = array<i32>} : memref<8x256xf32, #tpu.memory_space<vmem>>, vector<8x256xf32>,
    } else {
    }
    %c1_i32 = arith.constant 1 : i32
    %3 = arith.muli %arg0, %c1_i32 : i32
    %4 = arith.addi %3, %arg1 : i32
    %c8_i32 = arith.constant 8 : i32
    %5 = arith.muli %4, %c8_i32 : i32
    %c0 = arith.constant 0 : index
    %c0_1 = arith.constant 0 : index
    %6 = vector.load %arg2[%c0, %c0_1] : memref<8x256xf32, #tpu.memory_space<vmem>>, vector<8x256xf32>
    %c0_2 = arith.constant 0 : index
    %c0_3 = arith.constant 0 : index
    %7 = vector.load %arg3[%c0_2, %c0_3] : memref<8x256xf32, #tpu.memory_space<vmem>>, vector<8x256xf32>
    %cst = arith.constant 0.000000e+00 : f32
    %8 = vector.broadcast %cst : f32 to vector<8x256xf32>
    %9 = arith.maximumf %6, %8 : vector<8x256xf32>
    %10 = arith.mulf %6, %7 : vector<8x256xf32>
    %11 = arith.subf %9, %10 : vector<8x256xf32>
    %12 = math.absf %6 : vector<8x256xf32>
    %cst_4 = arith.constant 0.000000e+00 : f32
    %13 = vector.broadcast %cst_4 : f32 to vector<8x256xf32>
    %14 = arith.subf %13, %12 : vector<8x256xf32>
    %15 = math.exp %14 : vector<8x256xf32>
    %16 = math.log1p %15 : vector<8x256xf32>
    %17 = arith.addf %11, %16 : vector<8x256xf32>
    %18 = tpu.iota {dimensions = array<i32: 0>} : vector<8x256xi32>
    %c8_i32_5 = arith.constant 8 : i32
    %19 = arith.subi %c8_i32_5, %5 : i32
    %20 = vector.broadcast %19 : i32 to vector<8x256xi32>
    %21 = arith.cmpi slt, %18, %20 : vector<8x256xi32>
    %cst_6 = arith.constant 0.000000e+00 : f32
    %22 = vector.broadcast %cst_6 : f32 to vector<8x256xf32>
    %23 = arith.select %21, %17, %22 : vector<8x256xi1>, vector<8x256xf32>
    %c0_7 = arith.constant 0 : index
    %c0_8 = arith.constant 0 : index
    %24 = vector.load %arg4[%c0_7, %c0_8] : memref<8x256xf32, #tpu.memory_space<vmem>>, vector<8x256xf32>
    %25 = vector.shape_cast %23 : vector<8x256xf32> to vector<1x8x256xf32>
    %cst_9 = arith.constant dense<0.000000e+00> : vector<8x256xf32>
    %26 = vector.multi_reduction <add>, %25, %cst_9 [0] : vector<1x8x256xf32> to vector<8x256xf32>
    %27 = arith.addf %24, %26 : vector<8x256xf32>
    %c0_10 = arith.constant 0 : index
    %c0_11 = arith.constant 0 : index
    %28 = vector.load %arg4[%c0_10, %c0_11] : memref<8x256xf32, #tpu.memory_space<vmem>>, vector<8x256xf32>
    tpu.vector_store %arg4[%c0_10, %c0_11], %27 {strides = array<i32>} : memref<8x256xf32, #tpu.memory_space<vmem>>, vector<8x256xf32>,
    return
  }
  func.func @transform_0(%arg0: i32, %arg1: i32) -> (i32, i32) {
    %c1_i32 = arith.constant 1 : i32
    %0 = arith.muli %arg0, %c1_i32 : i32
    %1 = arith.addi %0, %arg1 : i32
    %c0_i32 = arith.constant 0 : i32
    %2 = arith.minsi %1, %c0_i32 : i32
    %c0_i32_0 = arith.constant 0 : i32
    %c0_i32_1 = arith.constant 0 : i32
    return %2, %c0_i32_0 : i32, i32
  }
  func.func @transform_1(%arg0: i32, %arg1: i32) -> (i32, i32) {
    %c1_i32 = arith.constant 1 : i32
    %0 = arith.muli %arg0, %c1_i32 : i32
    %1 = arith.addi %0, %arg1 : i32
    %c0_i32 = arith.constant 0 : i32
    %2 = arith.minsi %1, %c0_i32 : i32
    %c0_i32_0 = arith.constant 0 : i32
    %c0_i32_1 = arith.constant 0 : i32
    return %2, %c0_i32_0 : i32, i32
  }
  func.func @transform_2(%arg0: i32, %arg1: i32) -> (i32, i32) {
    %c0_i32 = arith.constant 0 : i32
    %c0_i32_0 = arith.constant 0 : i32
    return %arg0, %c0_i32 : i32, i32
  }
}

</mosaic_0001>

<bundles_post_ra>
// kernel: tpu_custom_call.1
= control target key start
LH: loop header
LB: loop body
LE: loop exit
PB: predicated region body
PF: predicated region fallthrough
CT: control target
= control target key end

     0   :  { %7 = vsyncpa [#allocation3], 0  ;;  %s273_s0 = inlined_call_operand.hbm [shape: f32[8,256], index: 0, kind: input, shape index: {}]   ;;  %s274_s1 = inlined_call_operand.hbm [shape: f32[8,256], index: 1, kind: input, shape index: {}]   ;;  %s275_s2 = inlined_call_operand.hbm [shape: f32[8,256], index: 2, kind: output, shape index: {}]  }
   0x1   :  { %8 = vsyncpa [#allocation6], 0 }
   0x2   :  { %9 = vsyncpa [#allocation4], 0  ;;  %s219_s9 = smov [#allocation2]   ;;  %s220_s11 = smov [#allocation5]  }
   0x3   :  { %s22_s10 = sshll.u32 %s219_s9, 4  ;;  %s38_s12 = sshll.u32 %s220_s11, 4  ;;  %s23_s10 = int_to_ptr.vmem [resolvable:$true] %s22_s10  ;;  %s39_s12 = int_to_ptr.vmem [resolvable:$true] %s38_s12 }
   0x4   :  { %s147_s15 = scalar_lea.hbm %s273_s0, 256 }
   0x5   :  { %p148_p0 = scmp.ne.s32.totalorder %s273_s0, %s147_s15  ;;  %p151_p1 = scmp.lt.u32.totalorder %s147_s15, %s273_s0 }
   0x7   :  { %p153_p2 = pnand %p151_p1, %p148_p0 }
   0x9   :  { %156 = shalt.err (!%p153_p2)
}
   0xa   :  { %s157_s20 = scalar_lea.vmem %s23_s10, 256  ;;  %p162_p4 = scmp.lt.s32.totalorder %s23_s10, %s23_s10 }
   0xb   :  { %p158_p3 = scmp.ne.s32.totalorder %s23_s10, %s157_s20  ;;  %p163_p5 = scmp.lt.s32.totalorder %s157_s20, %s157_s20 }
   0xd   :  { %p164_p6 = por %p163_p5, %p162_p4 }
   0xf   :  { %p165_p7 = pnand %p164_p6, %p158_p3 }
  0x11   :  { %168 = shalt.err (!%p165_p7)
}
  0x12   :  { %25 = dma.hbm_to_vmem [thread:$0]  %s273_s0, 256, %s23_s10, [#allocation3]  }
  0x13   :  { %s169_s25 = scalar_lea.hbm %s274_s1, 256 }
  0x14   :  { %p170_p8 = scmp.ne.s32.totalorder %s274_s1, %s169_s25  ;;  %p173_p9 = scmp.lt.u32.totalorder %s169_s25, %s274_s1 }
  0x16   :  { %p175_p10 = pnand %p173_p9, %p170_p8 }
  0x18   :  { %178 = shalt.err (!%p175_p10)
}
  0x19   :  { %s179_s30 = scalar_lea.vmem %s39_s12, 256  ;;  %p184_p12 = scmp.lt.s32.totalorder %s39_s12, %s39_s12 }
  0x1a   :  { %p180_p11 = scmp.ne.s32.totalorder %s39_s12, %s179_s30  ;;  %p185_p13 = scmp.lt.s32.totalorder %s179_s30, %s179_s30 }
  0x1c   :  { %p186_p0 = por %p185_p13, %p184_p12 }
  0x1e   :  { %p187_p1 = pnand %p186_p0, %p180_p11 }
  0x20   :  { %190 = shalt.err (!%p187_p1)
}
  0x21   :  { %41 = dma.hbm_to_vmem [thread:$0]  %s274_s1, 256, %s39_s12, [#allocation6]  }
  0x22   :  { %213 = dma.done.wait [#allocation3], 256  }
  0x23   :  { %214 = vsyncadd [#allocation3], 4294967040 }
  0x24   :  { %215 = dma.done.wait [#allocation6], 256  }
  0x25   :  { %216 = vsyncadd [#allocation6], 4294967040  ;;  %v62_v0 = vld [vmem:[#allocation2] sm:$0xff]  ;;  %v63_v1 = vld [vmem:[#allocation2 + $0x8] sm:$0xff]  ;;  %s221_s1 = smov [#allocation7]  }
  0x26   :  { %v72_v2 = vand.u32 2147483647, %v62_v0  ;;  %v73_v3 = vand.u32 2147483647, %v63_v1  ;;  %v64_v14 = vld [vmem:[#allocation5] sm:$0xff]  ;;  %v65_v15 = vld [vmem:[#allocation5 + $0x8] sm:$0xff] }
  0x27   :  { %v66_v17 = vmax.f32 %v62_v0, 0.0  ;;  %v68_v18 = vmul.f32 %v64_v14, %v62_v0  ;;  %v67_v21 = vmax.f32 %v63_v1, 0.0  ;;  %v69_v22 = vmul.f32 %v65_v15, %v63_v1  ;;  %s121_s4 = sshll.u32 %s221_s1, 4  ;;  %s122_s4 = int_to_ptr.vmem [resolvable:$true] %s121_s4 }
  0x28   :  { %v74_v4 = vsub.f32 0.0, %v72_v2  ;;  %v75_v5 = vsub.f32 0.0, %v73_v3  ;;  %s191_s5 = scalar_lea.vmem %s122_s4, 256  ;;  %p196_p3 = scmp.lt.s32.totalorder %s122_s4, %s122_s4 }
  0x29   :  { %v70_v26 = vsub.f32 %v66_v17, %v68_v18  ;;  %v71_v30 = vsub.f32 %v67_v21, %v69_v22  ;;  %p192_p2 = scmp.ne.s32.totalorder %s122_s4, %s191_s5  ;;  %p197_p4 = scmp.lt.s32.totalorder %s191_s5, %s191_s5 }
  0x2a   :  { %v76_v6 = vmul.f32 1.442695, %v74_v4  ;;  %v78_v7 = vmul.f32 1.442695, %v75_v5 }
  0x2b   :  { %p198_p5 = por %p197_p4, %p196_p3 }
  0x2c   :  { %139 = vpow2.f32 %v76_v6 }
  0x2d   :  { %141 = vpow2.f32 %v78_v7  ;;  %p199_p6 = pnand %p198_p5, %p192_p2 }
  0x36   :  { %v140_v8 = vpop.eup %139 }
  0x37   :  { %v142_v9 = vpop.eup %141  ;;  %v80_v10 = vadd.f32 1.0, %v140_v8  ;;  %v83_v12 = vmul.f32 -0.5, %v140_v8  ;;  %v86_v19 = vand.u32 2147483647, %v140_v8 }
  0x38   :  { %v89_v11 = vadd.f32 1.0, %v142_v9  ;;  %v92_v13 = vmul.f32 -0.5, %v142_v9  ;;  %v95_v23 = vand.u32 2147483647, %v142_v9 }
  0x39   :  { %143 = vlog2.f32 %v80_v10  ;;  %v84_v16 = vadd.f32 1.0, %v83_v12  ;;  %vm87_vm0 = vcmp.lt.f32.partialorder %v86_v19, 0.0004427343 }
  0x3a   :  { %145 = vlog2.f32 %v89_v11  ;;  %v93_v20 = vadd.f32 1.0, %v92_v13  ;;  %vm96_vm1 = vcmp.lt.f32.partialorder %v95_v23, 0.0004427343 }
  0x3b   :  { %v85_v24 = vmul.f32 %v140_v8, %v84_v16 }
  0x3c   :  { %v94_v27 = vmul.f32 %v142_v9, %v93_v20 }
  0x43   :  { %v144_v25 = vpop.eup %143 }
  0x44   :  { %v146_v28 = vpop.eup %145  ;;  %v82_v29 = vmul.f32 0.6931472, %v144_v25 }
  0x45   :  { %v91_v31 = vmul.f32 0.6931472, %v146_v28 }
  0x46   :  { %v88_v32 = vsel %vm87_vm0, %v85_v24, %v82_v29 }
  0x47   :  { %v98_v33 = vadd.f32 %v88_v32, %v70_v26  ;;  %v97_v34 = vsel %vm96_vm1, %v94_v27, %v91_v31 }
  0x48   :  { %v99_v35 = vadd.f32 %v97_v34, %v71_v30 }
  0x49   :  { %113 = vst [vmem:[#allocation7] sm:$0xff] %v98_v33 }
  0x4a   :  { %114 = vst [vmem:[#allocation7 + $0x8] sm:$0xff] %v99_v35 }
  0x4b   :  { %202 = shalt.err (!%p199_p6)
}
  0x4c   :  { %s203_s8 = scalar_lea.hbm %s275_s2, 256 }
  0x4d   :  { %p204_p7 = scmp.ne.s32.totalorder %s275_s2, %s203_s8  ;;  %p207_p8 = scmp.lt.u32.totalorder %s203_s8, %s275_s2 }
  0x4f   :  { %p209_p9 = pnand %p207_p8, %p204_p7 }
  0x51   :  { %212 = shalt.err (!%p209_p9)
}
  0x52   :  { %124 = dma.vmem_to_hbm [thread:$0]  %s122_s4, 256, %s275_s2, [#allocation4]  }
  0x53   :  { %217 = dma.done.wait [#allocation4], 256  }
  0x54   :  { %218 = vsyncadd [#allocation4], 4294967040 }
  0x55   :  { %128 = vsyncpa [#allocation3], 1 }
  0x56   :  { %129 = vsyncpa [#allocation6], 1 }
  0x57   :  { %130 = vsyncpa [#allocation4], 1 }

</bundles_post_ra>
